<compile_context>
chip_gen: v5e
topology: v5e:2x2
jax: 0.10.0
libtpu: 0.0.40
codegen_flags: <defaults>
</compile_context>

<pallas_src>
import math
import functools

import numpy as np
import jax
import jax.numpy as jnp
from jax.experimental import pallas as pl
from jax.experimental.pallas import tpu as pltpu

F32 = jnp.float32
BF16 = jnp.bfloat16

_PARALLEL1 = pltpu.CompilerParams(dimension_semantics=("parallel",))
_PARALLEL2 = pltpu.CompilerParams(dimension_semantics=("parallel", "parallel"))


# --------------------------------------------------------------------------- small helpers

def _round_up(n, m):
    return -(-n // m) * m


def _row_tiles(n, max_tile=1024, align=8):
    """Pad row count and pick a row tile (full array if it fits in one tile)."""
    n_pad = _round_up(n, align)
    if n_pad <= max_tile:
        return n_pad, n_pad
    n_pad = _round_up(n, max_tile)
    return n_pad, max_tile


def _pad_rows(x, n_pad):
    n = x.shape[0]
    return x if n == n_pad else jnp.pad(x, ((0, n_pad - n), (0, 0)))


# --------------------------------------------------------------------------- kernels

def _linear_kernel(x_ref, w_ref, b_ref, o_ref):
    # y = x @ W + b   (bf16 MXU operands, f32 accumulate, bf16 store)
    y = jnp.dot(x_ref[...].astype(BF16), w_ref[...],
                preferred_element_type=jnp.float32) + b_ref[...]
    o_ref[...] = y.astype(o_ref.dtype)


def linear(x, w, b, *, max_tile=1024):
    """Per-node-type input projection (input dims differ per type)."""
    n, din = x.shape
    dout = w.shape[1]
    n_pad, tile = _row_tiles(n, max_tile)
    out = pl.pallas_call(
        _linear_kernel,
        out_shape=jax.ShapeDtypeStruct((n_pad, dout), BF16),
        grid=(n_pad // tile,),
        in_specs=[pl.BlockSpec((tile, din), lambda i: (i, 0)),
                  pl.BlockSpec((din, dout), lambda i: (0, 0)),
                  pl.BlockSpec((1, dout), lambda i: (0, 0))],
        out_specs=pl.BlockSpec((tile, dout), lambda i: (i, 0)),
        compiler_params=_PARALLEL1,
    )(_pad_rows(x, n_pad), w, b)
    return out[:n]


def _proj_kernel(x_ref, w_ref, b_ref, o_ref):
    # batched (per node type) q projection: one [tile, Din] x [Din, Fc] matmul per step
    y = jnp.dot(x_ref[0], w_ref[0], preferred_element_type=jnp.float32) + b_ref[0]
    o_ref[0] = y.astype(o_ref.dtype)


def project_batched(x_slab, w, b, tile):
    """q projection for all node types in one gridded call.  x_slab: [T, Np, Din] bf16."""
    T, Np, din = x_slab.shape
    fout = w.shape[-1]
    return pl.pallas_call(
        _proj_kernel,
        out_shape=jax.ShapeDtypeStruct((T, Np, fout), BF16),
        grid=(T, Np // tile),
        in_specs=[pl.BlockSpec((1, tile, din), lambda t, i: (t, i, 0)),
                  pl.BlockSpec((1, din, fout), lambda t, i: (t, 0, 0)),
                  pl.BlockSpec((1, 1, fout), lambda t, i: (t, 0, 0))],
        out_specs=pl.BlockSpec((1, tile, fout), lambda t, i: (t, i, 0)),
        compiler_params=_PARALLEL2,
    )(x_slab, w, b)


def _kv_kernel(src_ref, x_ref, w_ref, b_ref, k_ref, v_ref, *, fc):
    # one matmul produces both the (relation-folded) k and v for this edge type / row tile
    y = jnp.dot(x_ref[0], w_ref[0], preferred_element_type=jnp.float32) + b_ref[0]
    k_ref[0] = y[:, :fc].astype(k_ref.dtype)
    v_ref[0] = y[:, fc:].astype(v_ref.dtype)


def kv_project_batched(x_slab, w, b, src_ids, fc, tile):
    """k/v projection for all edge types in one gridded call.

    The source node-type gather is done inside the index_map via scalar prefetch
    (src_ids[e] picks which slab of x_slab feeds edge type e) -> no HBM copy."""
    T, Np, din = x_slab.shape
    E = w.shape[0]
    grid_spec = pltpu.PrefetchScalarGridSpec(
        num_scalar_prefetch=1,
        grid=(E, Np // tile),
        in_specs=[pl.BlockSpec((1, tile, din), lambda e, i, src: (src[e], i, 0)),
                  pl.BlockSpec((1, din, 2 * fc), lambda e, i, src: (e, 0, 0)),
                  pl.BlockSpec((1, 1, 2 * fc), lambda e, i, src: (e, 0, 0))],
        out_specs=(pl.BlockSpec((1, tile, fc), lambda e, i, src: (e, i, 0)),
                   pl.BlockSpec((1, tile, fc), lambda e, i, src: (e, i, 0))),
    )
    k, v = pl.pallas_call(
        functools.partial(_kv_kernel, fc=fc),
        out_shape=(jax.ShapeDtypeStruct((E, Np, fc), BF16),
                   jax.ShapeDtypeStruct((E, Np, fc), BF16)),
        grid_spec=grid_spec,
        compiler_params=_PARALLEL2,
    )(src_ids, x_slab, w, b)
    return k, v


def _attn_kernel(q_ref, k_ref, v_ref, mask_ref, o_ref, m_sc, l_sc, acc_sc, *, heads, head_dim):
    # Flash-style online softmax over source tiles.
    # q: (td, H*D) bf16   k,v: (ts, H*D) bf16   mask: (td, ts) int8   out: (td, H*D) bf16
    # p_rel / sqrt(D) is already folded into k's projection weights.
    H, D = heads, head_dim
    j = pl.program_id(1)

    @pl.when(j == 0)
    def _():
        m_sc[...] = jnp.full(m_sc.shape, -1e30, jnp.float32)
        l_sc[...] = jnp.zeros(l_sc.shape, jnp.float32)
        acc_sc[...] = jnp.zeros(acc_sc.shape, jnp.float32)

    q = q_ref[...]
    k = k_ref[...]
    v = v_ref[...]
    mask_b = mask_ref[...] != 0                               # no int8 -> f32 cast pass
    bias = jnp.where(mask_b, 0.0, -1e30).astype(jnp.float32)  # one additive bias tile

    # Heads stay a short static unroll over static lane slices (H is tiny); every matmul is
    # a dimension_numbers contraction -- no `.T`, no (H, N, D) transposes.
    for h in range(H):
        qh = q[:, h * D:(h + 1) * D]
        kh = k[:, h * D:(h + 1) * D]
        vh = v[:, h * D:(h + 1) * D]
        logits = jax.lax.dot_general(qh, kh, (((1,), (1,)), ((), ())),
                                     preferred_element_type=jnp.float32) + bias
        m_prev = m_sc[:, h:h + 1]
        m_new = jnp.maximum(m_prev, jnp.max(logits, axis=-1, keepdims=True))
        a = jnp.exp(m_prev - m_new)
        p = jnp.where(mask_b, jnp.exp(logits - m_new), 0.0)   # needed for zero-degree rows
        l_sc[:, h:h + 1] = a * l_sc[:, h:h + 1] + jnp.sum(p, axis=-1, keepdims=True)
        acc_sc[:, h * D:(h + 1) * D] = (
            a * acc_sc[:, h * D:(h + 1) * D]
            + jax.lax.dot_general(p.astype(BF16), vh, (((1,), (0,)), ((), ())),
                                  preferred_element_type=jnp.float32))
        m_sc[:, h:h + 1] = m_new

    @pl.when(j == pl.num_programs(1) - 1)
    def _():
        outs = []
        for h in range(H):
            l = l_sc[:, h:h + 1]
            inv = pl.reciprocal(jnp.where(l > 0.0, l, 1.0), approx=True)
            outs.append(acc_sc[:, h * D:(h + 1) * D] * inv)
        # single lane-dense store of the full H*D output tile
        o_ref[...] = jnp.concatenate(outs, axis=-1).astype(o_ref.dtype)


def hgt_attention(q, k, v, mask, *, heads, head_dim, max_td=256, max_ts=512):
    nd, hd = q.shape
    ns = k.shape[0]
    # dst rows: int8 mask sublane granule -> align 32; td is a mult of 32 (or full)
    nd_pad, td = _row_tiles(nd, max_td, align=32)
    # src cols are the mask's lane axis -> always pad/tile to a multiple of 128
    ns_pad, ts = _row_tiles(ns, max_ts, align=128)
    qp = _pad_rows(q, nd_pad)
    kp = _pad_rows(k, ns_pad)
    vp = _pad_rows(v, ns_pad)
    mp = jnp.pad(mask, ((0, nd_pad - nd), (0, ns_pad - ns)))
    out = pl.pallas_call(
        functools.partial(_attn_kernel, heads=heads, head_dim=head_dim),
        out_shape=jax.ShapeDtypeStruct((nd_pad, hd), BF16),
        grid=(nd_pad // td, ns_pad // ts),
        in_specs=[pl.BlockSpec((td, hd), lambda i, j: (i, 0)),
                  pl.BlockSpec((ts, hd), lambda i, j: (j, 0)),
                  pl.BlockSpec((ts, hd), lambda i, j: (j, 0)),
                  pl.BlockSpec((td, ts), lambda i, j: (i, j))],
        out_specs=pl.BlockSpec((td, hd), lambda i, j: (i, 0)),
        scratch_shapes=[pltpu.VMEM((td, heads), jnp.float32),      # m
                        pltpu.VMEM((td, heads), jnp.float32),      # l
                        pltpu.VMEM((td, hd), jnp.float32)],        # acc
        compiler_params=pltpu.CompilerParams(
            dimension_semantics=("parallel", "arbitrary")),
    )(qp, kp, vp, mp)
    return out[:nd]


def _gelu_tanh(x):
    c = jnp.float32(0.7978845608028654)   # sqrt(2/pi)
    return 0.5 * x * (1.0 + jnp.tanh(c * (x + 0.044715 * x * x * x)))


def _epilogue_skip_kernel(g_ref, w_ref, b_ref, xin_ref, alpha_ref, o_ref, *, apply_relu):
    # Fused: tanh-GELU -> out_lin matmul -> gated skip -> (optional) ReLU.  f32 math.
    g = _gelu_tanh(g_ref[0].astype(jnp.float32))
    a = jnp.dot(g.astype(BF16), w_ref[0], preferred_element_type=jnp.float32) + b_ref[0]
    alpha = alpha_ref[pl.program_id(0)]                       # per-type scalar from SMEM
    o = alpha * a + (1.0 - alpha) * xin_ref[0].astype(jnp.float32)
    if apply_relu:
        o = jnp.maximum(o, 0.0)
    o_ref[0] = o.astype(o_ref.dtype)


def _epilogue_noskip_kernel(g_ref, w_ref, b_ref, o_ref, *, apply_relu):
    g = _gelu_tanh(g_ref[0].astype(jnp.float32))
    o = jnp.dot(g.astype(BF16), w_ref[0], preferred_element_type=jnp.float32) + b_ref[0]
    if apply_relu:
        o = jnp.maximum(o, 0.0)
    o_ref[0] = o.astype(o_ref.dtype)


def epilogue_batched(g_slab, w, b, x_in_slab, alpha_vec, *, apply_relu, has_skip,
                     out_dtype, tile):
    T, Np, fc_in = g_slab.shape
    fc_out = w.shape[-1]
    in_specs = [pl.BlockSpec((1, tile, fc_in), lambda t, i: (t, i, 0)),
                pl.BlockSpec((1, fc_in, fc_out), lambda t, i: (t, 0, 0)),
                pl.BlockSpec((1, 1, fc_out), lambda t, i: (t, 0, 0))]
    args = [g_slab, w, b]
    if has_skip:
        in_specs += [pl.BlockSpec((1, tile, fc_out), lambda t, i: (t, i, 0)),
                     pl.BlockSpec(memory_space=pltpu.MemorySpace.SMEM)]
        args += [x_in_slab, alpha_vec]
        kernel = functools.partial(_epilogue_skip_kernel, apply_relu=apply_relu)
    else:
        kernel = functools.partial(_epilogue_noskip_kernel, apply_relu=apply_relu)
    return pl.pallas_call(
        kernel,
        out_shape=jax.ShapeDtypeStruct((T, Np, fc_out), out_dtype),
        grid=(T, Np // tile),
        in_specs=in_specs,
        out_specs=pl.BlockSpec((1, tile, fc_out), lambda t, i: (t, i, 0)),
        compiler_params=_PARALLEL2,
    )(*args)


# --------------------------------------------------------------------------- glue

def hgt_conv(cp, x_slab, mask, src_ids, heads, out_channels, *, apply_relu, out_dtype,
             row_tile):
    """One HGTConv layer.  x_slab: [T, Np, Din] bf16.  mask: [T*Np, E*Np] int8."""
    T, Np, din = x_slab.shape
    E = cp['kv_w'].shape[0]
    H, Fc = heads, out_channels
    D = Fc // H

    # 1) q for all destination types, k/v (relation-folded) for all edge types
    q_slab = project_batched(x_slab, cp['q_w'], cp['q_b'], row_tile)          # [T,Np,Fc]
    k_slab, v_slab = kv_project_batched(x_slab, cp['kv_w'], cp['kv_b'], src_ids, Fc,
                                        row_tile)                             # [E,Np,Fc]

    # 2) grouped-softmax attention + aggregation (flash-style, src-tiled)
    agg = hgt_attention(q_slab.reshape(T * Np, Fc),
                        k_slab.reshape(E * Np, Fc),
                        v_slab.reshape(E * Np, Fc),
                        mask, heads=H, head_dim=D)
    agg = agg.reshape(T, Np, Fc)

    # 3) fused epilogue per node type: gelu -> out_lin -> gated skip (-> relu for layer 1)
    has_skip = (Fc == din)        # PyG: skip only when output dim matches input dim
    alpha = jax.nn.sigmoid(cp['skip']).astype(F32)          # [T]
    return epilogue_batched(agg, cp['out_w'], cp['out_b'], x_slab, alpha,
                            apply_relu=apply_relu, has_skip=has_skip,
                            out_dtype=out_dtype, tile=row_tile)


def hgt2_forward(params, x_dict, edge_index_dict, metadata, heads, hidden, out_c):
    node_types, edge_types = metadata
    T, E = len(node_types), len(edge_types)
    type_idx = {nt: i for i, nt in enumerate(node_types)}
    counts = {nt: x_dict[nt].shape[0] for nt in node_types}
    Np, row_tile = _row_tiles(max(counts.values()), 1024)

    # 0) per-type input Linear -> one padded bf16 slab [T, Np, hidden]
    h_list = []
    for nt in node_types:
        y = linear(x_dict[nt], params['lin_w'][nt], params['lin_b'][nt])
        h_list.append(jnp.pad(y, ((0, Np - y.shape[0]), (0, 0))))
    x_slab = jnp.stack(h_list, 0)

    # dense int8 bipartite adjacency mask in slab coordinates -- ONE scatter.
    # NOTE: duplicate (src, dst) edges collapse to one attention slot (differs from PyG's
    # scatter softmax only on multigraphs).
    rows, cols = [], []
    for e, et in enumerate(edge_types):
        src_nt, _, dst_nt = et
        ei = edge_index_dict[et]
        rows.append(ei[1] + type_idx[dst_nt] * Np)
        cols.append(ei[0] + e * Np)
    mask = jnp.zeros((T * Np, E * Np), jnp.int8)
    mask = mask.at[jnp.concatenate(rows), jnp.concatenate(cols)].set(1)

    src_ids = jnp.asarray([type_idx[et[0]] for et in edge_types], jnp.int32)

    h = hgt_conv(params['conv1'], x_slab, mask, src_ids, heads, hidden,
                 apply_relu=True, out_dtype=BF16, row_tile=row_tile)
    h = hgt_conv(params['conv2'], h, mask, src_ids, heads, out_c,
                 apply_relu=False, out_dtype=F32, row_tile=row_tile)

    return {nt: h[type_idx[nt], :counts[nt]] for nt in node_types}


# --------------------------------------------------------------------------- params

def _fold_conv_params(raw, metadata, heads, out_channels):
    """Fold k_rel/v_rel (and p_rel/sqrt(D)) into the kqv projection weights, once.
    Weights are stored stacked over node/edge types and in bf16; biases stay f32."""
    node_types, edge_types = metadata
    H, Fc = heads, out_channels
    D = Fc // H
    scale = 1.0 / math.sqrt(D)
    q_w = jnp.stack([raw['kqv_w'][nt][:, Fc:2 * Fc] for nt in node_types]).astype(BF16)
    q_b = jnp.stack([raw['kqv_b'][nt][:, Fc:2 * Fc] for nt in node_types])
    out_w = jnp.stack([raw['out_w'][nt] for nt in node_types]).astype(BF16)
    out_b = jnp.stack([raw['out_b'][nt] for nt in node_types])
    skip = jnp.stack([raw['skip'][nt] for nt in node_types])
    kv_w_list, kv_b_list = [], []
    for et in edge_types:
        key = '__'.join(et)
        src = et[0]
        in_c = raw['kqv_w'][src].shape[0]
        wk = raw['kqv_w'][src][:, :Fc].reshape(in_c, H, D)
        bk = raw['kqv_b'][src][:, :Fc].reshape(1, H, D)
        wv = raw['kqv_w'][src][:, 2 * Fc:].reshape(in_c, H, D)
        bv = raw['kqv_b'][src][:, 2 * Fc:].reshape(1, H, D)
        krel, vrel = raw['k_rel'][key], raw['v_rel'][key]          # (H, D, D)
        prel = (raw['p_rel'][key] * scale)[None, :, None]          # fold p_rel/sqrt(D) into k
        wk_f = (jnp.einsum('ihd,hde->ihe', wk, krel) * prel).reshape(in_c, Fc)
        bk_f = (jnp.einsum('ihd,hde->ihe', bk, krel) * prel).reshape(1, Fc)
        wv_f = jnp.einsum('ihd,hde->ihe', wv, vrel).reshape(in_c, Fc)
        bv_f = jnp.einsum('ihd,hde->ihe', bv, vrel).reshape(1, Fc)
        kv_w_list.append(jnp.concatenate([wk_f, wv_f], axis=1))
        kv_b_list.append(jnp.concatenate([bk_f, bv_f], axis=1))
    return {'q_w': q_w, 'q_b': q_b, 'out_w': out_w, 'out_b': out_b, 'skip': skip,
            'kv_w': jnp.stack(kv_w_list).astype(BF16), 'kv_b': jnp.stack(kv_b_list)}


def init_params(key, in_channels_dict, hidden, out_c, metadata, heads):
    node_types, edge_types = metadata
    keys = iter(jax.random.split(key, 256))

    def nrm(shape, scale=0.1):
        return (scale * jax.random.normal(next(keys), shape)).astype(F32)

    params = {'lin_w': {}, 'lin_b': {}}
    for nt, din in in_channels_dict.items():
        params['lin_w'][nt] = nrm((din, hidden)).astype(BF16)
        params['lin_b'][nt] = nrm((1, hidden))

    def raw_conv(in_c, o_c):
        d = o_c // heads
        cp = {'kqv_w': {}, 'kqv_b': {}, 'out_w': {}, 'out_b': {}, 'skip': {},
              'k_rel': {}, 'v_rel': {}, 'p_rel': {}}
        for nt in node_types:
            cp['kqv_w'][nt] = nrm((in_c, 3 * o_c))
            cp['kqv_b'][nt] = nrm((1, 3 * o_c))
            cp['out_w'][nt] = nrm((o_c, o_c))
            cp['out_b'][nt] = nrm((1, o_c))
            cp['skip'][nt] = jnp.float32(1.0)            # PyG inits skip to 1
        for et in edge_types:
            k = '__'.join(et)
            cp['k_rel'][k] = nrm((heads, d, d))
            cp['v_rel'][k] = nrm((heads, d, d))
            cp['p_rel'][k] = jnp.ones((heads,), F32)     # PyG inits p_rel to 1
        return cp

    # relation / p_rel folding done HERE (once), not in the forward hot path
    params['conv1'] = _fold_conv_params(raw_conv(hidden, hidden), metadata, heads, hidden)
    params['conv2'] = _fold_conv_params(raw_conv(hidden, out_c), metadata, heads, out_c)
    return params


# --------------------------------------------------------------------------- main

if __name__ == "__main__":
    node_types = ['author', 'paper']
    edge_types = [('author', 'writes', 'paper'), ('paper', 'written_by', 'author')]
    metadata = (node_types, edge_types)
    in_channels_dict = {'author': 6, 'paper': 10}
    hidden, out_c, heads = 32, 32, 2
    n_nodes = {'author': 8, 'paper': 8}

    key = jax.random.PRNGKey(0)
    ka, kp = jax.random.split(key)
    x_dict = {
        'author': jax.random.normal(ka, (n_nodes['author'], in_channels_dict['author']), F32),
        'paper':  jax.random.normal(kp, (n_nodes['paper'],  in_channels_dict['paper']),  F32),
    }

    def make_edges(n_src, n_dst):
        i = np.arange(n_src)
        src = np.concatenate([i, i])
        dst = np.concatenate([(i * 3 + 1) % n_dst, (i * 5 + 2) % n_dst])   # 16 unique edges
        return jnp.asarray(np.stack([src, dst]), jnp.int32)

    edge_index_dict = {
        ('author', 'writes', 'paper'):      make_edges(n_nodes['author'], n_nodes['paper']),
        ('paper', 'written_by', 'author'):  make_edges(n_nodes['paper'],  n_nodes['author']),
    }

    params = init_params(jax.random.PRNGKey(42), in_channels_dict, hidden, out_c,
                         metadata, heads)

    out = hgt2_forward(params, x_dict, edge_index_dict, metadata, heads, hidden, out_c)
    for v in out.values():
        jax.block_until_ready(v)
    assert out['author'].shape == (n_nodes['author'], out_c)
    assert out['paper'].shape == (n_nodes['paper'], out_c)
    print("KERNEL_OK")
</pallas_src>

<mosaic_0001>
module attributes {stable_mosaic.version = 11 : i64} {
  func.func @_linear_kernel(%arg0: i32, %arg1: memref<8x6xf32, #tpu.memory_space<vmem>>, %arg2: memref<6x32xbf16, #tpu.memory_space<vmem>>, %arg3: memref<1x32xf32, #tpu.memory_space<vmem>>, %arg4: memref<8x32xbf16, #tpu.memory_space<vmem>>) attributes {dimension_semantics = [#tpu.dimension_semantics<parallel>], iteration_bounds = array<i64: 1>, scalar_prefetch = 0 : i64, scratch_operands = 0 : i64, tpu.core_type = #tpu.core_type<tc>, window_params = [{transform_indices = @transform_0, window_bounds = array<i64: 8, 6>}, {pipeline_mode = #tpu.pipeline_mode<synchronous>, transform_indices = @transform_1, window_bounds = array<i64: 6, 32>}, {pipeline_mode = #tpu.pipeline_mode<synchronous>, transform_indices = @transform_2, window_bounds = array<i64: 1, 32>}, {transform_indices = @transform_3, window_bounds = array<i64: 8, 32>}]} {
    %c0 = arith.constant 0 : index
    %c0_0 = arith.constant 0 : index
    %0 = vector.load %arg1[%c0, %c0_0] : memref<8x6xf32, #tpu.memory_space<vmem>>, vector<8x6xf32>
    %1 = arith.truncf %0 : vector<8x6xf32> to vector<8x6xbf16>
    %c0_1 = arith.constant 0 : index
    %c0_2 = arith.constant 0 : index
    %2 = vector.load %arg2[%c0_1, %c0_2] : memref<6x32xbf16, #tpu.memory_space<vmem>>, vector<6x32xbf16>
    %cst = arith.constant dense<0.000000e+00> : vector<8x32xf32>
    %3 = tpu.matmul %1, %2, %cst {dimension_numbers = #tpu.dot_dimension_numbers<[1], [0], [0], [1], [0, 0, 1, 1], [], []>} : vector<8x6xbf16>, vector<6x32xbf16>, vector<8x32xf32> -> vector<8x32xf32>
    %c0_3 = arith.constant 0 : index
    %c0_4 = arith.constant 0 : index
    %4 = vector.load %arg3[%c0_3, %c0_4] : memref<1x32xf32, #tpu.memory_space<vmem>>, vector<1x32xf32>
    %5 = vector.broadcast %4 : vector<1x32xf32> to vector<8x32xf32>
    %6 = arith.addf %3, %5 : vector<8x32xf32>
    %7 = arith.truncf %6 : vector<8x32xf32> to vector<8x32xbf16>
    %c0_5 = arith.constant 0 : index
    %c0_6 = arith.constant 0 : index
    %8 = vector.load %arg4[%c0_5, %c0_6] : memref<8x32xbf16, #tpu.memory_space<vmem>>, vector<8x32xbf16>
    tpu.vector_store %arg4[%c0_5, %c0_6], %7 {strides = array<i32>} : memref<8x32xbf16, #tpu.memory_space<vmem>>, vector<8x32xbf16>,
    return
  }
  func.func @transform_0(%arg0: i32) -> (i32, i32) {
    %c0_i32 = arith.constant 0 : i32
    %c0_i32_0 = arith.constant 0 : i32
    return %arg0, %c0_i32 : i32, i32
  }
  func.func @transform_1(%arg0: i32) -> (i32, i32) {
    %c0_i32 = arith.constant 0 : i32
    %c0_i32_0 = arith.constant 0 : i32
    %c0_i32_1 = arith.constant 0 : i32
    return %c0_i32, %c0_i32_0 : i32, i32
  }
  func.func @transform_2(%arg0: i32) -> (i32, i32) {
    %c0_i32 = arith.constant 0 : i32
    %c0_i32_0 = arith.constant 0 : i32
    %c0_i32_1 = arith.constant 0 : i32
    return %c0_i32, %c0_i32_0 : i32, i32
  }
  func.func @transform_3(%arg0: i32) -> (i32, i32) {
    %c0_i32 = arith.constant 0 : i32
    %c0_i32_0 = arith.constant 0 : i32
    return %arg0, %c0_i32 : i32, i32
  }
}

</mosaic_0001>

<bundles_post_ra>
// kernel: tpu_custom_call.1
= control target key start
LH: loop header
LB: loop body
LE: loop exit
PB: predicated region body
PF: predicated region fallthrough
CT: control target
= control target key end

     0   :  { %8 = vsyncpa [#allocation3], 0  ;;  %s211_s0 = inlined_call_operand.hbm [shape: f32[8,6], index: 0, kind: input, shape index: {}]   ;;  %s212_s1 = inlined_call_operand.hbm [shape: bf16[6,32], index: 1, kind: input, shape index: {}]   ;;  %s213_s2 = inlined_call_operand.vmem [shape: f32[1,32], index: 2, kind: input, shape index: {}]   ;;  %s214_s3 = inlined_call_operand.hbm [shape: bf16[8,32], index: 3, kind: output, shape index: {}]  }
   0x1   :  { %9 = vsyncpa [#allocation6], 0 }
   0x2   :  { %10 = vsyncpa [#allocation4], 0  ;;  %s16_s14 = sshll.u32 %s211_s0, 4  ;;  %s176_s15 = smov [#allocation2]   ;;  %s17_s14 = int_to_ptr.hbm [resolvable:$true] %s16_s14 }
   0x3   :  { %s18_s16 = sshll.u32 %s176_s15, 4  ;;  %s27_s19 = sshll.u32 %s212_s1, 4  ;;  %s19_s16 = int_to_ptr.vmem [resolvable:$true] %s18_s16  ;;  %s28_s19 = int_to_ptr.hbm [resolvable:$true] %s27_s19 }
   0x4   :  { %21 = dma.hbm_to_vmem [thread:$0]  %s17_s14, 128, %s19_s16, [#allocation3]  }
   0x5   :  { %s177_s20 = smov [#allocation5]  }
   0x6   :  { %s29_s21 = sshll.u32 %s177_s20, 4  ;;  %s30_s21 = int_to_ptr.vmem [resolvable:$true] %s29_s21 }
   0x7   :  { %32 = dma.hbm_to_vmem [thread:$0]  %s28_s19, 64, %s30_s21, [#allocation6]  }
   0x8   :  { %170 = dma.done.wait [#allocation3], 128  }
   0x9   :  { %171 = vsyncadd [#allocation3], 4294967168 }
   0xa   :  { %172 = dma.done.wait [#allocation6], 64  }
   0xb   :  { %173 = vsyncadd [#allocation6], 4294967232  ;;  %vm55_vm0 = vcmask 1042432   ;;  %v46_v0 = vld [vmem:[#allocation5] sm:$0x7]  ;;  %v44_v1 = vld [vmem:[#allocation2] sm:$0xff] }
   0xc   :  { %v57_v2 = vsel %vm55_vm0, %v46_v0, 0  ;;  %v45_v3 = vpack.c.bf16 %v44_v1, %v44_v1  ;;  %vm51_vm1 = vcmask 48128   ;;  %v97_v4 = vld [vmem:[%s213_s2] ss:$0 sm:$0xff]  ;;  %s178_s22 = smov [#allocation7]   ;;  %s82_s26 = sshll.u32 %s214_s3, 4  ;;  %s83_s26 = int_to_ptr.hbm [resolvable:$true] %s82_s26 }
   0xd   :  { %66 = vmatpush.bf16.msra.mxu0 %v57_v2  ;;  %s80_s23 = sshll.u32 %s178_s22, 4  ;;  %vm73_vm2 = vcmask 257024   ;;  %s81_s23 = int_to_ptr.vmem [resolvable:$true] %s80_s23 }
  0x10   :  { %93 = vmatmul.msk.bf16.vlgmr.msra.gmra.mxu0 %vm51_vm1, %v45_v3 }
  0x8d   :  { %v68_v5 = vpop.f32.mrf.mxu0 }
  0x8e   :  { %v69_v6 = vadd.f32 %v97_v4, %v68_v5 }
  0x90   :  { %v72_v7 = vpack.c.bf16 %v69_v6, %v69_v6 }
  0x92   :  { %74 = vst.msk [vmem:[#allocation7] sm:$0xf] %vm73_vm2, %v72_v7 }
  0x93   :  { %85 = dma.vmem_to_hbm [thread:$0]  %s81_s23, 64, %s83_s26, [#allocation4]  }
  0x95   :  { %v70_v8 = vpop.f32.mrf.mxu0 }
  0x96   :  { %174 = dma.done.wait [#allocation4], 64  }
  0x97   :  { %175 = vsyncadd [#allocation4], 4294967232 }
  0x98   :  { %90 = vsyncpa [#allocation3], 1 }
  0x99   :  { %91 = vsyncpa [#allocation6], 1 }
  0x9a   :  { %92 = vsyncpa [#allocation4], 1 }

</bundles_post_ra>
